<compile_context>
chip_gen: v6e
topology: v6e:2x2x1
jax: 0.10.0
libtpu: 0.0.40
codegen_flags: <defaults>
</compile_context>

<pallas_src>
import functools

import jax
import jax.numpy as jnp
import numpy as np
from jax import lax
from jax.experimental import pallas as pl
from jax.experimental.pallas import tpu as pltpu

_E = float(np.e)   # exp(1.0): closed form of softmax over a 0/1 mask.
_TINY = 1e-30      # clamp before log() against exp underflow.


def _round_up(x, m):
    return -(-x // m) * m


def _tile_rows(b):
    """Row-tile size tq and padded row count bp.

    tq=128 fills the MXU M dimension on v5e (128x128) and is the VMEM sweet
    spot on v7x (64 MiB); v6e (128 MiB) also tolerates 256 but 128 is within a
    few percent.  Small batches use a single 8-aligned tile instead of padding
    all the way up to 128.
    """
    tq = 128 if b >= 128 else max(8, _round_up(b, 8))
    return tq, _round_up(b, tq)


def _vmem_limit_bytes(b, d, tq):
    est = (2 * b * d * 2        # resident s (bf16, double-buffered)
           + 4 * tq * d * 2     # im + diag-s tiles (bf16, double-buffered)
           + 6 * tq * b * 4     # f32 (tq, b) temporaries: logits / eL / mask ...
           + 16 * b * 4)        # (1, b) partial outputs, id vectors
    est = int(est * 1.5) + (1 << 20)
    return max(32 * 1024 * 1024, min(est, 64 * 1024 * 1024))


def _compiler_params(b, d, tq):
    return pltpu.CompilerParams(
        dimension_semantics=("parallel",),   # independent row tiles -> megacore on v7x
        vmem_limit_bytes=_vmem_limit_bytes(b, d, tq))


# --------------------------------------------------------------------------
# Kernels (each grid step emits per-tile partials; a JAX epilogue combines)
# --------------------------------------------------------------------------
def _infonce_kernel(scale_ref, im_ref, s_ref, sdiag_ref,
                    rowp_ref, diagp_ref, tm_ref, colsum_ref, *, nvalid, padded):
    """entities is None: per-tile partials of the symmetric InfoNCE loss."""
    tq = im_ref.shape[0]
    scale = jnp.exp(scale_ref[0, 0])

    # (tq, b) f32 logits from a bf16 MXU matmul (contraction on dim 1 of both).
    logits = scale * lax.dot_general(
        im_ref[...], s_ref[...],
        dimension_numbers=(((1,), (1,)), ((), ())),
        preferred_element_type=jnp.float32)

    if padded:
        ridx = (pl.program_id(0) * tq
                + lax.broadcasted_iota(jnp.int32, (tq, 1), 0))
        rvalid_b = ridx < nvalid                                # (tq, 1) bool
        rvalid = rvalid_b.astype(jnp.float32)
        logits_m = jnp.where(rvalid_b, logits, -jnp.inf)        # drop padded rows
    else:
        logits_m = logits

    # One shared exp pass (per-tile max shift) feeds row AND column logsumexp.
    tm = jnp.max(jnp.max(logits_m, axis=1, keepdims=True), axis=0, keepdims=True)
    eL = jnp.exp(logits_m - tm)                                 # 0 on padded rows
    row_sum = jnp.maximum(jnp.sum(eL, axis=1, keepdims=True), _TINY)
    row_lse = jnp.log(row_sum) + tm                             # (tq, 1)
    if padded:
        row_lse = row_lse * rvalid

    rowp_ref[...] = jnp.sum(row_lse, axis=0, keepdims=True).reshape(1, 1, 1)
    tm_ref[...] = tm.reshape(1, 1, 1)
    colsum_ref[...] = jnp.sum(eL, axis=0, keepdims=True).reshape(1, 1, -1)

    # Diagonal of scale * im @ s.T for this row tile (padded rows are zero).
    prod = im_ref[...].astype(jnp.float32) * sdiag_ref[...].astype(jnp.float32)
    diag_rows = jnp.sum(prod, axis=1, keepdims=True)            # (tq, 1)
    diagp_ref[...] = (scale * jnp.sum(diag_rows, axis=0, keepdims=True)
                      ).reshape(1, 1, 1)


def _entity_ce_kernel(scale_ref, im_ref, s_ref, idr_ref, idc_ref,
                      imgp_ref, tm_ref, colsum_ref, colnum_ref, colk_ref,
                      *, nvalid, padded):
    """entity_loss == 'crossentropy': soft-target CE, mask rebuilt from ids."""
    tq = im_ref.shape[0]
    b = s_ref.shape[0]
    em1 = _E - 1.0
    scale = jnp.exp(scale_ref[0, 0])

    logits = scale * lax.dot_general(
        im_ref[...], s_ref[...],
        dimension_numbers=(((1,), (1,)), ((), ())),
        preferred_element_type=jnp.float32)                     # (tq, b)

    # 0/1 entity mask rebuilt in-kernel from the int32 id vectors (padded rows
    # carry a -1 sentinel id so they match nothing).
    mask = (idr_ref[...] == idc_ref[...]).astype(jnp.float32)   # (tq, b)
    ml = mask * logits                                          # CSE: rows & cols

    if padded:
        ridx = (pl.program_id(0) * tq
                + lax.broadcasted_iota(jnp.int32, (tq, 1), 0))
        rvalid_b = ridx < nvalid
        rvalid = rvalid_b.astype(jnp.float32)
        logits_m = jnp.where(rvalid_b, logits, -jnp.inf)
    else:
        logits_m = logits

    tm = jnp.max(jnp.max(logits_m, axis=1, keepdims=True), axis=0, keepdims=True)
    eL = jnp.exp(logits_m - tm)
    row_sum = jnp.maximum(jnp.sum(eL, axis=1, keepdims=True), _TINY)

    # softmax(mask, dim=1) closed form: (1 + (e-1)m) / (b + (e-1)k_row)
    # -> soft-target dot product needs only O(b) divisions per tile.
    k_row = jnp.sum(mask, axis=1, keepdims=True)
    wrow = ((jnp.sum(logits, axis=1, keepdims=True)
             + em1 * jnp.sum(ml, axis=1, keepdims=True))
            / (float(b) + em1 * k_row))
    row_term = jnp.log(row_sum) + tm - wrow                     # (tq, 1)
    if padded:
        row_term = row_term * rvalid

    imgp_ref[...] = jnp.sum(row_term, axis=0, keepdims=True).reshape(1, 1, 1)
    tm_ref[...] = tm.reshape(1, 1, 1)
    colsum_ref[...] = jnp.sum(eL, axis=0, keepdims=True).reshape(1, 1, -1)
    # Padded rows contribute exactly 0 below (zero im rows -> zero raw logits,
    # zero mask), so no rvalid weighting is needed on the column side.
    colnum_ref[...] = (jnp.sum(logits, axis=0, keepdims=True)
                       + em1 * jnp.sum(ml, axis=0, keepdims=True)
                       ).reshape(1, 1, -1)
    colk_ref[...] = jnp.sum(mask, axis=0, keepdims=True).reshape(1, 1, -1)


def _entity_bce_kernel(scale_ref, im_ref, s_ref, idr_ref, idc_ref,
                       colp_ref, *, nvalid, padded):
    """entity_loss == 'bce': BCE-with-logits over the flattened logits."""
    tq = im_ref.shape[0]
    scale = jnp.exp(scale_ref[0, 0])
    x = scale * lax.dot_general(
        im_ref[...], s_ref[...],
        dimension_numbers=(((1,), (1,)), ((), ())),
        preferred_element_type=jnp.float32)                     # (tq, b)
    eq = idr_ref[...] == idc_ref[...]

    # Stable BCE-with-logits: max(x,0) - x*t + log(1 + exp(-|x|)).
    per = (jnp.maximum(x, 0.0) - jnp.where(eq, x, 0.0)
           + jnp.log(1.0 + jnp.exp(-jnp.abs(x))))
    if padded:
        ridx = (pl.program_id(0) * tq
                + lax.broadcasted_iota(jnp.int32, (tq, 1), 0))
        per = per * (ridx < nvalid).astype(jnp.float32)

    # Only a sublane reduce per tile; the cross-lane reduce is in the epilogue.
    colp_ref[...] = jnp.sum(per, axis=0, keepdims=True).reshape(1, 1, -1)


# --------------------------------------------------------------------------
# Wrappers
# --------------------------------------------------------------------------
def _pad_rows(x, bp, value=0):
    b = x.shape[0]
    if bp == b:
        return x
    return jnp.pad(x, ((0, bp - b),) + ((0, 0),) * (x.ndim - 1),
                   constant_values=value)


@jax.jit
def _run_plain(logit_scale, im, s):
    b, d = im.shape
    tq, bp = _tile_rows(b)
    nt = bp // tq
    padded = bp != b

    scale2d = jnp.reshape(logit_scale, (1, 1)).astype(jnp.float32)
    im_bf = _pad_rows(im, bp).astype(jnp.bfloat16)
    s_bf = s.astype(jnp.bfloat16)
    sdiag_bf = _pad_rows(s, bp).astype(jnp.bfloat16)

    kernel = functools.partial(_infonce_kernel, nvalid=b, padded=padded)
    smem_spec = pl.BlockSpec(memory_space=pltpu.MemorySpace.SMEM)
    rowp, diagp, tms, colsums = pl.pallas_call(
        kernel,
        out_shape=(jax.ShapeDtypeStruct((nt, 1, 1), jnp.float32),   # row lse partials
                   jax.ShapeDtypeStruct((nt, 1, 1), jnp.float32),   # diag partials
                   jax.ShapeDtypeStruct((nt, 1, 1), jnp.float32),   # per-tile max
                   jax.ShapeDtypeStruct((nt, 1, b), jnp.float32)),  # col exp-sum partials
        grid=(nt,),
        in_specs=[smem_spec,
                  pl.BlockSpec((tq, d), lambda i: (i, 0)),    # im row tile
                  pl.BlockSpec((b, d), lambda i: (0, 0)),     # s (VMEM-resident)
                  pl.BlockSpec((tq, d), lambda i: (i, 0))],   # diag s row tile
        out_specs=(pl.BlockSpec((1, 1, 1), lambda i: (i, 0, 0)),
                   pl.BlockSpec((1, 1, 1), lambda i: (i, 0, 0)),
                   pl.BlockSpec((1, 1, 1), lambda i: (i, 0, 0)),
                   pl.BlockSpec((1, 1, b), lambda i: (i, 0, 0))),
        compiler_params=_compiler_params(b, d, tq),
    )(scale2d, im_bf, s_bf, sdiag_bf)

    # Tiny epilogue: exact online-logsumexp combine of the per-tile partials.
    tms = tms.reshape(nt)
    gmax = jnp.max(tms)
    col = jnp.sum(colsums.reshape(nt, b) * jnp.exp(tms - gmax)[:, None], axis=0)
    col_lse_total = jnp.sum(jnp.log(jnp.maximum(col, _TINY))) + b * gmax
    return (jnp.sum(rowp) + col_lse_total - 2.0 * jnp.sum(diagp)) / (2.0 * b)


@functools.partial(jax.jit, static_argnames=("mode",))
def _run_entity(logit_scale, im, s, ids, mode):
    b, d = im.shape
    tq, bp = _tile_rows(b)
    nt = bp // tq
    padded = bp != b
    em1 = _E - 1.0

    scale2d = jnp.reshape(logit_scale, (1, 1)).astype(jnp.float32)
    im_bf = _pad_rows(im, bp).astype(jnp.bfloat16)
    s_bf = s.astype(jnp.bfloat16)
    ids = ids.astype(jnp.int32)
    ids_row = _pad_rows(ids.reshape(b, 1), bp, value=-1)   # -1: matches nothing
    ids_col = ids.reshape(1, b)

    smem_spec = pl.BlockSpec(memory_space=pltpu.MemorySpace.SMEM)
    in_specs = [smem_spec,
                pl.BlockSpec((tq, d), lambda i: (i, 0)),
                pl.BlockSpec((b, d), lambda i: (0, 0)),
                pl.BlockSpec((tq, 1), lambda i: (i, 0)),
                pl.BlockSpec((1, b), lambda i: (0, 0))]
    cparams = _compiler_params(b, d, tq)

    if mode == "crossentropy":
        kernel = functools.partial(_entity_ce_kernel, nvalid=b, padded=padded)
        imgp, tms, colsums, colnums, colks = pl.pallas_call(
            kernel,
            out_shape=(jax.ShapeDtypeStruct((nt, 1, 1), jnp.float32),
                       jax.ShapeDtypeStruct((nt, 1, 1), jnp.float32),
                       jax.ShapeDtypeStruct((nt, 1, b), jnp.float32),
                       jax.ShapeDtypeStruct((nt, 1, b), jnp.float32),
                       jax.ShapeDtypeStruct((nt, 1, b), jnp.float32)),
            grid=(nt,),
            in_specs=in_specs,
            out_specs=(pl.BlockSpec((1, 1, 1), lambda i: (i, 0, 0)),
                       pl.BlockSpec((1, 1, 1), lambda i: (i, 0, 0)),
                       pl.BlockSpec((1, 1, b), lambda i: (i, 0, 0)),
                       pl.BlockSpec((1, 1, b), lambda i: (i, 0, 0)),
                       pl.BlockSpec((1, 1, b), lambda i: (i, 0, 0))),
            compiler_params=cparams,
        )(scale2d, im_bf, s_bf, ids_row, ids_col)

        tms = tms.reshape(nt)
        gmax = jnp.max(tms)
        col = jnp.sum(colsums.reshape(nt, b) * jnp.exp(tms - gmax)[:, None], axis=0)
        col_lse = jnp.log(jnp.maximum(col, _TINY)) + gmax            # (b,)
        colnum = jnp.sum(colnums.reshape(nt, b), axis=0)
        colk = jnp.sum(colks.reshape(nt, b), axis=0)
        wcol = colnum / (b + em1 * colk)
        ce_txt = jnp.sum(col_lse - wcol) / b
        ce_img = jnp.sum(imgp) / b
        return 0.5 * (ce_img + ce_txt)

    # mode == "bce"
    kernel = functools.partial(_entity_bce_kernel, nvalid=b, padded=padded)
    colp = pl.pallas_call(
        kernel,
        out_shape=jax.ShapeDtypeStruct((nt, 1, b), jnp.float32),
        grid=(nt,),
        in_specs=in_specs,
        out_specs=pl.BlockSpec((1, 1, b), lambda i: (i, 0, 0)),
        compiler_params=cparams,
    )(scale2d, im_bf, s_bf, ids_row, ids_col)
    return jnp.sum(colp) / float(b * b)


def _entities_to_ids(entities):
    id_map = {}
    ids = []
    for e in entities:
        if e not in id_map:
            id_map[e] = len(id_map)
        ids.append(id_map[e])
    return ids


class InfoNCELossEntityAware:
    """JAX/Pallas port of the PyTorch InfoNCELossEntityAware module."""

    def __init__(self, entity_loss="crossentropy"):
        # nn.Parameter(torch.ones([]) * np.log(1 / 0.07)) — deterministic init.
        self.logit_scale = jnp.asarray(np.log(1.0 / 0.07), dtype=jnp.float32)
        self.entity_loss = entity_loss

    def __call__(self, im, s, entities=None):
        if entities is None:
            return _run_plain(self.logit_scale, im, s)
        # Entity-string -> id mapping is host-side Python glue (strings cannot
        # enter a TPU kernel); only the length-B int32 id vector goes to HBM.
        ids = jnp.asarray(_entities_to_ids(entities), dtype=jnp.int32)
        return _run_entity(self.logit_scale, im, s, ids, mode=self.entity_loss)


# --------------------------------------------------------------------------
# Pure-JAX references (for verification)
# --------------------------------------------------------------------------
def _ref_none(logit_scale, im, s):
    L = jnp.exp(logit_scale) * im @ s.T
    lse_r = jax.scipy.special.logsumexp(L, axis=1)
    lse_c = jax.scipy.special.logsumexp(L, axis=0)
    d = jnp.diagonal(L)
    return 0.5 * (jnp.mean(lse_r - d) + jnp.mean(lse_c - d))


def _ref_ce(logit_scale, im, s, mask):
    L = jnp.exp(logit_scale) * im @ s.T
    s_dist = jax.nn.softmax(mask, axis=1)
    img_dist = jax.nn.softmax(mask, axis=0).T
    ce_img = jnp.mean(-jnp.sum(s_dist * jax.nn.log_softmax(L, axis=1), axis=1))
    ce_txt = jnp.mean(-jnp.sum(img_dist * jax.nn.log_softmax(L.T, axis=1), axis=1))
    return 0.5 * (ce_img + ce_txt)


def _ref_bce(logit_scale, im, s, mask):
    x = (jnp.exp(logit_scale) * im @ s.T).reshape(-1)
    t = mask.reshape(-1)
    return jnp.mean(jnp.maximum(x, 0.0) - x * t + jnp.log1p(jnp.exp(-jnp.abs(x))))


# --------------------------------------------------------------------------
if __name__ == "__main__":
    def _check(name, got, want, tol=2e-3):
        ok = jnp.allclose(got, want, rtol=tol, atol=tol)
        assert ok, (name, float(got), float(want))

    vocab = ["cat", "dog", "bird", "fish", "ant", "bee", "fox"]
    D = 32
    # 24: single tile, no padding; 200: two tiles + 56 padded rows; 256: two
    # full tiles, no padding — covers all static kernel specializations.
    for B in (24, 200, 256):
        key = jax.random.PRNGKey(0)
        k1, k2 = jax.random.split(key)
        im = jax.random.normal(k1, (B, D), dtype=jnp.float32)
        s = jax.random.normal(k2, (B, D), dtype=jnp.float32)
        # CLIP-style features are L2-normalized; pre-round to bf16 so the f32
        # references see exactly the values the bf16 MXU operands carry.
        im = im / jnp.linalg.norm(im, axis=-1, keepdims=True)
        s = s / jnp.linalg.norm(s, axis=-1, keepdims=True)
        im = im.astype(jnp.bfloat16).astype(jnp.float32)
        s = s.astype(jnp.bfloat16).astype(jnp.float32)

        entities = [vocab[i % len(vocab)] for i in range(B)]
        ids = jnp.asarray(_entities_to_ids(entities), dtype=jnp.int32)
        mask = (ids[:, None] == ids[None, :]).astype(jnp.float32)

        # --- entities=None path ---
        mod = InfoNCELossEntityAware(entity_loss="crossentropy")
        loss_none = jax.block_until_ready(mod(im, s, entities=None))
        _check("plain", loss_none, _ref_none(mod.logit_scale, im, s))

        # --- entity-aware crossentropy path ---
        loss_ce = jax.block_until_ready(mod(im, s, entities=entities))
        _check("ce", loss_ce, _ref_ce(mod.logit_scale, im, s, mask))

        # --- entity-aware bce path ---
        mod_bce = InfoNCELossEntityAware(entity_loss="bce")
        loss_bce = jax.block_until_ready(mod_bce(im, s, entities=entities))
        _check("bce", loss_bce, _ref_bce(mod_bce.logit_scale, im, s, mask))

    print("KERNEL_OK")
</pallas_src>

<mosaic_0001>
module attributes {stable_mosaic.version = 11 : i64} {
  func.func @_infonce_kernel(%arg0: i32, %arg1: memref<1x1xf32, #tpu.memory_space<smem>>, %arg2: memref<24x32xbf16, #tpu.memory_space<vmem>>, %arg3: memref<24x32xbf16, #tpu.memory_space<vmem>>, %arg4: memref<24x32xbf16, #tpu.memory_space<vmem>>, %arg5: memref<1x1x1xf32, #tpu.memory_space<vmem>>, %arg6: memref<1x1x1xf32, #tpu.memory_space<vmem>>, %arg7: memref<1x1x1xf32, #tpu.memory_space<vmem>>, %arg8: memref<1x1x24xf32, #tpu.memory_space<vmem>>) attributes {dimension_semantics = [#tpu.dimension_semantics<parallel>], iteration_bounds = array<i64: 1>, scalar_prefetch = 0 : i64, scratch_operands = 0 : i64, tpu.core_type = #tpu.core_type<tc>, window_params = [{transform_indices = @transform_0, window_bounds = array<i64: 1, 1>}, {transform_indices = @transform_1, window_bounds = array<i64: 24, 32>}, {pipeline_mode = #tpu.pipeline_mode<synchronous>, transform_indices = @transform_2, window_bounds = array<i64: 24, 32>}, {transform_indices = @transform_3, window_bounds = array<i64: 24, 32>}, {transform_indices = @transform_4, window_bounds = array<i64: 1, 1, 1>}, {transform_indices = @transform_5, window_bounds = array<i64: 1, 1, 1>}, {transform_indices = @transform_6, window_bounds = array<i64: 1, 1, 1>}, {transform_indices = @transform_7, window_bounds = array<i64: 1, 1, 24>}]} {
    %c0 = arith.constant 0 : index
    %c0_0 = arith.constant 0 : index
    %0 = memref.load %arg1[%c0, %c0_0] : memref<1x1xf32, #tpu.memory_space<smem>>
    %1 = math.exp %0 : f32
    %c0_1 = arith.constant 0 : index
    %c0_2 = arith.constant 0 : index
    %2 = vector.load %arg2[%c0_1, %c0_2] : memref<24x32xbf16, #tpu.memory_space<vmem>>, vector<24x32xbf16>
    %c0_3 = arith.constant 0 : index
    %c0_4 = arith.constant 0 : index
    %3 = vector.load %arg3[%c0_3, %c0_4] : memref<24x32xbf16, #tpu.memory_space<vmem>>, vector<24x32xbf16>
    %cst = arith.constant dense<0.000000e+00> : vector<24x24xf32>
    %4 = tpu.matmul %2, %3, %cst {dimension_numbers = #tpu.dot_dimension_numbers<[1], [1], [0], [0], [0, 0, 1, 0], [], []>} : vector<24x32xbf16>, vector<24x32xbf16>, vector<24x24xf32> -> vector<24x24xf32>
    %5 = vector.broadcast %1 : f32 to vector<24x24xf32>
    %6 = arith.mulf %5, %4 : vector<24x24xf32>
    %cst_5 = arith.constant dense<0xFF800000> : vector<24xf32>
    %7 = vector.multi_reduction <maximumf>, %6, %cst_5 [1] : vector<24x24xf32> to vector<24xf32>
    %8 = vector.shape_cast %7 : vector<24xf32> to vector<24x1xf32>
    %cst_6 = arith.constant dense<0xFF800000> : vector<1xf32>
    %9 = vector.multi_reduction <maximumf>, %8, %cst_6 [0] : vector<24x1xf32> to vector<1xf32>
    %10 = vector.shape_cast %9 : vector<1xf32> to vector<1x1xf32>
    %11 = vector.broadcast %10 : vector<1x1xf32> to vector<24x24xf32>
    %12 = arith.subf %6, %11 : vector<24x24xf32>
    %13 = math.exp %12 : vector<24x24xf32>
    %cst_7 = arith.constant dense<0.000000e+00> : vector<24xf32>
    %14 = vector.multi_reduction <add>, %13, %cst_7 [1] : vector<24x24xf32> to vector<24xf32>
    %15 = vector.shape_cast %14 : vector<24xf32> to vector<24x1xf32>
    %cst_8 = arith.constant 1.000000e-30 : f32
    %16 = vector.broadcast %cst_8 : f32 to vector<24x1xf32>
    %17 = arith.maximumf %15, %16 : vector<24x1xf32>
    %18 = math.log %17 : vector<24x1xf32>
    %19 = vector.broadcast %10 : vector<1x1xf32> to vector<24x1xf32>
    %20 = arith.addf %18, %19 : vector<24x1xf32>
    %cst_9 = arith.constant dense<0.000000e+00> : vector<1xf32>
    %21 = vector.multi_reduction <add>, %20, %cst_9 [0] : vector<24x1xf32> to vector<1xf32>
    %22 = vector.shape_cast %21 : vector<1xf32> to vector<1x1xf32>
    %23 = vector.shape_cast %22 : vector<1x1xf32> to vector<1x1x1xf32>
    %c0_10 = arith.constant 0 : index
    %c0_11 = arith.constant 0 : index
    %c0_12 = arith.constant 0 : index
    %24 = vector.load %arg5[%c0_10, %c0_11, %c0_12] : memref<1x1x1xf32, #tpu.memory_space<vmem>>, vector<1x1x1xf32>
    tpu.vector_store %arg5[%c0_10, %c0_11, %c0_12], %23 {strides = array<i32>} : memref<1x1x1xf32, #tpu.memory_space<vmem>>, vector<1x1x1xf32>,
    %25 = vector.shape_cast %10 : vector<1x1xf32> to vector<1x1x1xf32>
    %c0_13 = arith.constant 0 : index
    %c0_14 = arith.constant 0 : index
    %c0_15 = arith.constant 0 : index
    %26 = vector.load %arg7[%c0_13, %c0_14, %c0_15] : memref<1x1x1xf32, #tpu.memory_space<vmem>>, vector<1x1x1xf32>
    tpu.vector_store %arg7[%c0_13, %c0_14, %c0_15], %25 {strides = array<i32>} : memref<1x1x1xf32, #tpu.memory_space<vmem>>, vector<1x1x1xf32>,
    %cst_16 = arith.constant dense<0.000000e+00> : vector<24xf32>
    %27 = vector.multi_reduction <add>, %13, %cst_16 [0] : vector<24x24xf32> to vector<24xf32>
    %28 = vector.shape_cast %27 : vector<24xf32> to vector<1x24xf32>
    %29 = vector.shape_cast %28 : vector<1x24xf32> to vector<1x1x24xf32>
    %c0_17 = arith.constant 0 : index
    %c0_18 = arith.constant 0 : index
    %c0_19 = arith.constant 0 : index
    %30 = vector.load %arg8[%c0_17, %c0_18, %c0_19] : memref<1x1x24xf32, #tpu.memory_space<vmem>>, vector<1x1x24xf32>
    tpu.vector_store %arg8[%c0_17, %c0_18, %c0_19], %29 {strides = array<i32>} : memref<1x1x24xf32, #tpu.memory_space<vmem>>, vector<1x1x24xf32>,
    %c0_20 = arith.constant 0 : index
    %c0_21 = arith.constant 0 : index
    %31 = vector.load %arg2[%c0_20, %c0_21] : memref<24x32xbf16, #tpu.memory_space<vmem>>, vector<24x32xbf16>
    %32 = arith.extf %31 : vector<24x32xbf16> to vector<24x32xf32>
    %c0_22 = arith.constant 0 : index
    %c0_23 = arith.constant 0 : index
    %33 = vector.load %arg4[%c0_22, %c0_23] : memref<24x32xbf16, #tpu.memory_space<vmem>>, vector<24x32xbf16>
    %34 = arith.extf %33 : vector<24x32xbf16> to vector<24x32xf32>
    %35 = arith.mulf %32, %34 : vector<24x32xf32>
    %cst_24 = arith.constant dense<0.000000e+00> : vector<24xf32>
    %36 = vector.multi_reduction <add>, %35, %cst_24 [1] : vector<24x32xf32> to vector<24xf32>
    %37 = vector.shape_cast %36 : vector<24xf32> to vector<24x1xf32>
    %cst_25 = arith.constant dense<0.000000e+00> : vector<1xf32>
    %38 = vector.multi_reduction <add>, %37, %cst_25 [0] : vector<24x1xf32> to vector<1xf32>
    %39 = vector.shape_cast %38 : vector<1xf32> to vector<1x1xf32>
    %40 = vector.broadcast %1 : f32 to vector<1x1xf32>
    %41 = arith.mulf %40, %39 : vector<1x1xf32>
    %42 = vector.shape_cast %41 : vector<1x1xf32> to vector<1x1x1xf32>
    %c0_26 = arith.constant 0 : index
    %c0_27 = arith.constant 0 : index
    %c0_28 = arith.constant 0 : index
    %43 = vector.load %arg6[%c0_26, %c0_27, %c0_28] : memref<1x1x1xf32, #tpu.memory_space<vmem>>, vector<1x1x1xf32>
    tpu.vector_store %arg6[%c0_26, %c0_27, %c0_28], %42 {strides = array<i32>} : memref<1x1x1xf32, #tpu.memory_space<vmem>>, vector<1x1x1xf32>,
    return
  }
  func.func @transform_0(%arg0: i32) -> (i32, i32) {
    %c0_i32 = arith.constant 0 : i32
    %c0_i32_0 = arith.constant 0 : i32
    %c0_i32_1 = arith.constant 0 : i32
    return %c0_i32, %c0_i32_0 : i32, i32
  }
  func.func @transform_1(%arg0: i32) -> (i32, i32) {
    %c0_i32 = arith.constant 0 : i32
    %c0_i32_0 = arith.constant 0 : i32
    return %arg0, %c0_i32 : i32, i32
  }
  func.func @transform_2(%arg0: i32) -> (i32, i32) {
    %c0_i32 = arith.constant 0 : i32
    %c0_i32_0 = arith.constant 0 : i32
    %c0_i32_1 = arith.constant 0 : i32
    return %c0_i32, %c0_i32_0 : i32, i32
  }
  func.func @transform_3(%arg0: i32) -> (i32, i32) {
    %c0_i32 = arith.constant 0 : i32
    %c0_i32_0 = arith.constant 0 : i32
    return %arg0, %c0_i32 : i32, i32
  }
  func.func @transform_4(%arg0: i32) -> (i32, i32, i32) {
    %c0_i32 = arith.constant 0 : i32
    %c0_i32_0 = arith.constant 0 : i32
    %c0_i32_1 = arith.constant 0 : i32
    return %arg0, %c0_i32, %c0_i32_0 : i32, i32, i32
  }
  func.func @transform_5(%arg0: i32) -> (i32, i32, i32) {
    %c0_i32 = arith.constant 0 : i32
    %c0_i32_0 = arith.constant 0 : i32
    %c0_i32_1 = arith.constant 0 : i32
    return %arg0, %c0_i32, %c0_i32_0 : i32, i32, i32
  }
  func.func @transform_6(%arg0: i32) -> (i32, i32, i32) {
    %c0_i32 = arith.constant 0 : i32
    %c0_i32_0 = arith.constant 0 : i32
    %c0_i32_1 = arith.constant 0 : i32
    return %arg0, %c0_i32, %c0_i32_0 : i32, i32, i32
  }
  func.func @transform_7(%arg0: i32) -> (i32, i32, i32) {
    %c0_i32 = arith.constant 0 : i32
    %c0_i32_0 = arith.constant 0 : i32
    %c0_i32_1 = arith.constant 0 : i32
    return %arg0, %c0_i32, %c0_i32_0 : i32, i32, i32
  }
}

</mosaic_0001>

<bundles_post_ra>
// kernel: _run_plain.1
= control target key start
LH: loop header
LB: loop body
LE: loop exit
PB: predicated region body
PF: predicated region fallthrough
CT: control target
= control target key end

     0   :  { %14 = vsyncpa [#allocation4], 0  ;;  %vm52_vm0 = vcmask 261120   ;;  %s495_s0 = inlined_call_operand.<no memory space> [shape: f32[1,1], index: 0, kind: input, shape index: {}]   ;;  %s496_s1 = inlined_call_operand.vmem [shape: bf16[24,32], index: 1, kind: input, shape index: {}]   ;;  %s497_s2 = inlined_call_operand.vmem [shape: bf16[24,32], index: 2, kind: input, shape index: {}, may-alias: {2,3}]   ;;  %s498_s3 = inlined_call_operand.vmem [shape: bf16[24,32], index: 3, kind: input, shape index: {}, may-alias: {2,3}]   ;;  %s499_s4 = inlined_call_operand.hbm [shape: f32[1,1,1], index: 4, kind: output, shape index: {0}]   ;;  %s500_s5 = inlined_call_operand.hbm [shape: f32[1,1,1], index: 5, kind: output, shape index: {1}]   ;;  %s501_s6 = inlined_call_operand.hbm [shape: f32[1,1,1], index: 6, kind: output, shape index: {2}]   ;;  %s502_s7 = inlined_call_operand.vmem [shape: f32[1,1,24], index: 7, kind: output, shape index: {3}]  }
   0x1   :  { %v298_v0 = vld [vmem:[%s497_s2 + $0x8] ss:$0 sps:$4 sm:$0xff]   ;;  %v299_v1 = vld [vmem:[%s497_s2] sm:$0xff]   ;;  %v26_v2 = vstv %s495_s0 }
   0x2   :  { %291 = vmatprep.subr.msk.bf16.mxu0 %vm52_vm0, %v298_v0  ;;  %v63_v3 = vsel %vm52_vm0, %v298_v0, 0  ;;  %v300_v4 = vld [vmem:[%s496_s1] sm:$0xff]   ;;  %v27_v5 = vmul.f32 1.442695, %v26_v2 }
   0x3   :  { %284 = vmatpush3.bf16.xpose.msra.mxu0 %v63_v3  ;;  %287 = vmatprep.mubr.msk.bf16.mxu0 %vm52_vm0, %v300_v4 }
   0x4   :  { %292 = vmatprep.subr.msk.bf16.mxu0 %vm52_vm0, %v299_v1 }
   0x5   :  { %15 = vsyncpa [#allocation6], 0  ;;  %302 = vpow2.f32 %v27_v5  ;;  %v60_v6 = vsel %vm52_vm0, %v299_v1, 0  ;;  %v301_v7 = vld [vmem:[%s496_s1 + $0x8] ss:$0 sps:$4 sm:$0xff]   ;;  %vm117_vm1 = vcmask 195584  }
   0x6   :  { %vm173_vm2 = vcmask 0   ;;  %v272_v37 = vld [vmem:[%s496_s1] sm:$0xff]   ;;  %v188_v41 = vld [vmem:[%s496_s1 + $0x8] sm:$0xf]  ;;  %vm184_vm3 = vcmask 188416   ;;  %s381_s19 = smov [#allocation7]  }
   0x7   :  { %v276_v38 = vld [vmem:[%s498_s3] sm:$0xff]   ;;  %v273_v39 = vunpack.c.l.bf16 %v272_v37  ;;  %v194_v42 = vld [vmem:[%s498_s3 + $0x8] sm:$0xf]  ;;  %v191_v44 = vunpack.c.l.bf16 %v188_v41  ;;  %v274_v47 = vunpack.c.h.bf16 %v272_v37  ;;  %s246_s20 = sshll.u32 %s381_s19, 4  ;;  %s247_s20 = int_to_ptr.vmem [resolvable:$true] %s246_s20 }
   0x8   :  { %v277_v40 = vunpack.c.l.bf16 %v276_v38  ;;  %v197_v45 = vunpack.c.l.bf16 %v194_v42  ;;  %v278_v48 = vunpack.c.h.bf16 %v276_v38 }
   0xa   :  { %v198_v43 = vmul.f32 %v277_v40, %v273_v39  ;;  %v200_v55 = vmul.f32 %v197_v45, %v191_v44  ;;  %v199_v57 = vmul.f32 %v278_v48, %v274_v47 }
   0xb   :  { %286 = vmatpush3.bf16.xpose.msra.mxu0 %v60_v6 }
   0xc   :  { %v201_v54 = vsel %vm52_vm0, %v198_v43, 0.0  ;;  %v207_v60 = vsel %vm52_vm0, %v200_v55, 0.0  ;;  %v204_v61 = vsel %vm52_vm0, %v199_v57, 0.0 }
  0x12   :  { %v303_v8 = vpop.eup %302  ;;  %288 = vmatmul.mubr.msk.bf16.vlgmr.msra.gmra.mxu0 %vm52_vm0, %v301_v7 }
  0x13   :  { %293 = vpush %v303_v8 }
  0x44   :  { %s294_s9 = spop %293 }
  0x45   :  { %v444_v9 = vstv %s294_s9 }
  0xd2   :  { %v289_v10 = vpop.f32.mrf.mxu0 }
  0xd3   :  { %v116_v11 = vmul.f32 %v289_v10, %v444_v9 }
  0xd4   :  { %v99_v12 = vpop.f32.mrf.mxu0 }
  0xd5   :  { %v114_v13 = vmul.f32 %v444_v9, %v99_v12  ;;  %v124_v14 = vsel %vm117_vm1, %v116_v11, -inf }
  0xd6   :  { %v290_v15 = vpop.f32.mrf.mxu0  ;;  %125 = vmax.xlane.f32.xlu1 %v124_v14 }
  0xd7   :  { %v118_v16 = vsel %vm117_vm1, %v114_v13, -inf }
  0xd8   :  { %v102_v17 = vpop.f32.mrf.mxu0  ;;  %119 = vmax.xlane.f32.xlu0 %v118_v16 }
  0xd9   :  { %v115_v18 = vmul.f32 %v444_v9, %v102_v17 }
  0xdb   :  { %v121_v19 = vsel %vm117_vm1, %v115_v18, -inf }
  0xdc   :  { %122 = vmax.xlane.f32.xlu0 %v121_v19 }
 0x15f   :  { %v126_v23 = vpop.xlane.xlu1 %125 }
 0x161   :  { %v120_v20 = vpop.xlane.xlu0 %119 }
 0x165   :  { %v123_v21 = vpop.xlane.xlu0 %122 }
 0x166   :  { %v127_v22 = vmax.f32 %v120_v20, %v123_v21 }
 0x168   :  { %v128_v24 = vmax.f32 %v127_v22, %v126_v23 }
 0x16a   :  { %v129_v25 = vrot.slane %v128_v24, 4 }
 0x16c   :  { %v130_v26 = vmax.f32 %v128_v24, %v129_v25 }
 0x16e   :  { %v131_v27 = vrot.slane %v130_v26, 2 }
 0x170   :  { %v132_v28 = vmax.f32 %v130_v26, %v131_v27 }
 0x172   :  { %v133_v29 = vrot.slane %v132_v28, 1 }
 0x174   :  { %v452_v30 = vmax.f32 %v132_v28, %v133_v29 }
 0x176   :  { %v136_v31 = vsub.f32 %v115_v18, %v452_v30  ;;  %v135_v32 = vsub.f32 %v114_v13, %v452_v30  ;;  %v137_v33 = vsub.f32 %v116_v11, %v452_v30  ;;  %175 = vst.msk [vmem:[#allocation7] sm:$0x1] %vm173_vm2, %v452_v30 }
 0x178   :  { %v140_v34 = vmul.f32 1.442695, %v136_v31  ;;  %v138_v35 = vmul.f32 1.442695, %v135_v32  ;;  %v142_v36 = vmul.f32 1.442695, %v137_v33 }
 0x17a   :  { %304 = vpow2.f32 %v140_v34 }
 0x17b   :  { %306 = vpow2.f32 %v138_v35 }
 0x17c   :  { %308 = vpow2.f32 %v142_v36 }
 0x187   :  { %v305_v46 = vpop.eup %304 }
 0x188   :  { %v307_v49 = vpop.eup %306  ;;  %v147_v50 = vsel %vm117_vm1, %v305_v46, 0.0 }
 0x189   :  { %v309_v51 = vpop.eup %308  ;;  %148 = vadd.xlane.f32.xlu0 %v147_v50  ;;  %v144_v52 = vsel %vm117_vm1, %v307_v49, 0.0 }
 0x18a   :  { %145 = vadd.xlane.f32.xlu1 %v144_v52  ;;  %v176_v53 = vadd.f32 %v147_v50, %v144_v52  ;;  %v150_v56 = vsel %vm117_vm1, %v309_v51, 0.0 }
 0x18c   :  { %v177_v58 = vadd.f32 %v176_v53, %v150_v56 }
 0x18d   :  { %202 = vadd.xlane.f32.xlu0 %v201_v54 }
 0x18e   :  { %151 = vadd.xlane.f32.xlu1 %v150_v56  ;;  %v178_v59 = vrot.slane %v177_v58, 4 }
 0x190   :  { %v179_v62 = vadd.f32 %v178_v59, %v177_v58 }
 0x191   :  { %208 = vadd.xlane.f32.xlu0 %v207_v60 }
 0x192   :  { %v180_v63 = vrot.slane %v179_v62, 2  ;;  %205 = vadd.xlane.f32.xlu1 %v204_v61 }
 0x194   :  { %v181_v0 = vadd.f32 %v180_v63, %v179_v62 }
 0x196   :  { %v182_v1 = vrot.slane %v181_v0, 1 }
 0x198   :  { %v183_v2 = vadd.f32 %v182_v1, %v181_v0 }
 0x19a   :  { %185 = vst.msk [vmem:[%s502_s7] sm:$0x1] %vm184_vm3, %v183_v2  ;;  %s380_s7 = smov [#allocation5]  }
 0x19b   :  { %s236_s18 = sshll.u32 %s380_s7, 4  ;;  %s237_s18 = int_to_ptr.vmem [resolvable:$true] %s236_s18 }
 0x19c   :  { %s316_s21 = scalar_lea.vmem %s237_s18, 16  ;;  %s320_s22 = scalar_lea.vmem %s237_s18, 32 }
 0x19d   :  { %p317_p0 = scmp.ne.s32.totalorder %s237_s18, %s316_s21  ;;  %p321_p1 = scmp.lt.s32.totalorder %s237_s18, %s237_s18 }
 0x19e   :  { %p322_p2 = scmp.lt.s32.totalorder %s320_s22, %s316_s21 }
 0x1a0   :  { %p323_p3 = por %p322_p2, %p321_p1 }
 0x1a2   :  { %p324_p4 = pnand %p323_p3, %p317_p0 }
 0x212   :  { %v149_v3 = vpop.xlane.xlu0 %148 }
 0x213   :  { %v154_v4 = vmax.f32 %v149_v3, 1e-30  ;;  %v146_v5 = vpop.xlane.xlu1 %145 }
 0x214   :  { %v153_v6 = vmax.f32 %v146_v5, 1e-30 }
 0x215   :  { %310 = vlog2.f32 %v154_v4 }
 0x216   :  { %312 = vlog2.f32 %v153_v6  ;;  %v203_v7 = vpop.xlane.xlu0 %202 }
 0x217   :  { %v152_v8 = vpop.xlane.xlu1 %151 }
 0x218   :  { %v155_v10 = vmax.f32 %v152_v8, 1e-30 }
 0x21a   :  { %314 = vlog2.f32 %v155_v10  ;;  %v209_v12 = vpop.xlane.xlu0 %208 }
 0x21b   :  { %v206_v11 = vpop.xlane.xlu1 %205 }
 0x21c   :  { %v210_v13 = vadd.f32 %v206_v11, %v203_v7 }
 0x21e   :  { %v211_v14 = vadd.f32 %v210_v13, %v209_v12 }
 0x220   :  { %v212_v15 = vrot.slane %v211_v14, 4 }
 0x222   :  { %v311_v16 = vpop.eup %310  ;;  %v213_v17 = vadd.f32 %v212_v15, %v211_v14 }
 0x223   :  { %v313_v18 = vpop.eup %312  ;;  %v159_v19 = vmul.f32 0.6931472, %v311_v16 }
 0x224   :  { %v157_v20 = vmul.f32 0.6931472, %v313_v18  ;;  %v214_v21 = vrot.slane %v213_v17, 2 }
 0x225   :  { %v163_v22 = vadd.f32 %v159_v19, %v452_v30 }
 0x226   :  { %v162_v23 = vadd.f32 %v157_v20, %v452_v30  ;;  %v215_v24 = vadd.f32 %v214_v21, %v213_v17 }
 0x227   :  { %v315_v25 = vpop.eup %314 }
 0x228   :  { %v161_v26 = vmul.f32 0.6931472, %v315_v25  ;;  %v216_v27 = vrot.slane %v215_v24, 1  ;;  %v165_v28 = vadd.f32 %v163_v22, %v162_v23 }
 0x22a   :  { %v164_v29 = vadd.f32 %v161_v26, %v452_v30  ;;  %v217_v31 = vadd.f32 %v216_v27, %v215_v24 }
 0x22c   :  { %v218_v32 = vmul.f32 %v217_v31, %v444_v9  ;;  %v166_v33 = vadd.f32 %v165_v28, %v164_v29 }
 0x22e   :  { %219 = vst.msk [vmem:[#allocation5] sm:$0x1] %vm173_vm2, %v218_v32  ;;  %v167_v34 = vrot.slane %v166_v33, 4 }
 0x22f   :  { %327 = shalt.err (!%p324_p4)
}
 0x230   :  { %239 = dma.vmem_to_hbm [thread:$0]  %s237_s18, 16, %s500_s5, [#allocation6]   ;;  %v168_v30 = vadd.f32 %v167_v34, %v166_v33 }
 0x231   :  { %s336_s25 = scalar_lea.vmem %s247_s20, 16  ;;  %s340_s26 = scalar_lea.vmem %s247_s20, 32 }
 0x232   :  { %p337_p5 = scmp.ne.s32.totalorder %s247_s20, %s336_s25  ;;  %p341_p6 = scmp.lt.s32.totalorder %s247_s20, %s247_s20 }
 0x233   :  { %p342_p7 = scmp.lt.s32.totalorder %s340_s26, %s336_s25 }
 0x235   :  { %p343_p8 = por %p342_p7, %p341_p6 }
 0x237   :  { %p344_p9 = pnand %p343_p8, %p337_p5 }
 0x239   :  { %347 = shalt.err (!%p344_p9)
}
 0x23a   :  { %249 = dma.vmem_to_hbm [thread:$0]  %s247_s20, 16, %s501_s6, [#allocation6]   ;;  %v169_v9 = vrot.slane %v168_v30, 2 }
 0x23b   :  { %s382_s29 = smov [#allocation3]  }
 0x23c   :  { %v170_v35 = vadd.f32 %v169_v9, %v168_v30  ;;  %s226_s30 = sshll.u32 %s382_s29, 4  ;;  %s227_s30 = int_to_ptr.vmem [resolvable:$true] %s226_s30 }
 0x23d   :  { %s356_s5 = scalar_lea.vmem %s227_s30, 16  ;;  %s360_s8 = scalar_lea.vmem %s227_s30, 32 }
 0x23e   :  { %v171_v36 = vrot.slane %v170_v35, 1  ;;  %p357_p10 = scmp.ne.s32.totalorder %s227_s30, %s356_s5  ;;  %p361_p11 = scmp.lt.s32.totalorder %s227_s30, %s227_s30 }
 0x23f   :  { %p362_p12 = scmp.lt.s32.totalorder %s360_s8, %s356_s5 }
 0x240   :  { %v172_v37 = vadd.f32 %v171_v36, %v170_v35 }
 0x241   :  { %p363_p13 = por %p362_p12, %p361_p11 }
 0x242   :  { %174 = vst.msk [vmem:[#allocation3] sm:$0x1] %vm173_vm2, %v172_v37 }
 0x243   :  { %p364_p0 = pnand %p363_p13, %p357_p10 }
 0x245   :  { %367 = shalt.err (!%p364_p0)
}
 0x246   :  { %229 = dma.vmem_to_hbm [thread:$0]  %s227_s30, 16, %s499_s4, [#allocation4]  }
 0x247   :  { %376 = dma.done.wait [#allocation4], 16  }
 0x248   :  { %377 = vsyncadd [#allocation4], 4294967280 }
 0x249   :  { %378 = dma.done.wait [#allocation6], 32  }
 0x24a   :  { %379 = vsyncadd [#allocation6], 4294967264 }
 0x24b   :  { %263 = vsyncpa [#allocation4], 1 }
 0x24c   :  { %264 = vsyncpa [#allocation6], 1 }

</bundles_post_ra>
